<compile_context>
chip_gen: v5e
topology: v5e:2x2
jax: 0.10.0
libtpu: 0.0.40
codegen_flags: <defaults>
</compile_context>

<pallas_src>
import jax
import jax.numpy as jnp
from jax.experimental import pallas as pl
from jax.experimental.pallas import tpu as pltpu


def _round_up(v, m):
    return (v + m - 1) // m * m


def _choose_batch_tile(B, C, max_rows=1024):
    """Smallest tB with B % tB == 0 and (tB*C) % 8 == 0 (sublane rule on the
    streamed (tB*C, tHW) block), so the 'parallel' batch grid axis gets the
    largest possible extent (v7x megacore sharding)."""
    for tB in range(1, B + 1):
        if B % tB == 0 and (tB * C) % 8 == 0 and tB * C <= max_rows:
            return tB
    return B  # fallback: block rows == full array rows (always a legal block)


def _choose_hw_tile(HW, target):
    """Largest 128-lane-multiple tile <= target that divides HW (else full extent)."""
    if HW <= target:
        return HW
    t = (target // 128) * 128
    while t >= 128:
        if HW % t == 0:
            return t
        t -= 128
    return HW


def conditional_regressor_kernel(x_ref, wrep_ref, sel_ref, b1_ref, w2_ref, b2_ref,
                                 o_ref, acc_ref):
    """One (batch_tile, hw_tile) grid step.

    x_ref    : (tR, tHW)   f32  streamed, sublane-dense input block (tR = tB*C)
    wrep_ref : (tR, F)     f32  ((wbb @ w1) / HW) replicated tB times along rows
    sel_ref  : (tB, tR)    f32  one-hot batch-group selector: sel[b, r] = [r//C == b]
    b1_ref   : (1, F)      f32
    w2_ref   : (F, O_pad)  f32  zero-padded to a 128-lane multiple
    b2_ref   : (1, O_pad)  f32
    o_ref    : (tB, O_pad) f32
    acc_ref  : (tR, tHW)   f32  VMEM scratch, lane-dense spatial-sum accumulator
    """
    hw = pl.program_id(1)

    @pl.when(hw == 0)
    def _init():
        acc_ref[...] = jnp.zeros_like(acc_ref)

    # Steady-state body: pure VPU add with unmasked lane-dense stores.  The
    # cross-lane (XLU) reduce is deferred to the finalize step below.
    acc_ref[...] += x_ref[...]

    @pl.when(hw == pl.num_programs(1) - 1)
    def _finalize():
        ssum = jnp.sum(acc_ref[...], axis=-1, keepdims=True)            # (tR, 1)
        # Un-flatten rows (b*C + c) -> (b, c) and contract over C without any
        # in-kernel reshape: scale each row by the replicated fused weight,
        # then a tiny one-hot selector matmul sums the C rows per batch element.
        contrib = ssum * wrep_ref[...]                                   # (tR, F)
        h = jnp.dot(sel_ref[...], contrib,
                    preferred_element_type=jnp.float32) + b1_ref[...]    # (tB, F)
        h = jnp.maximum(h, 0.0)              # ReLU (dropout = identity at eval)
        logits = jnp.dot(h, w2_ref[...],
                         preferred_element_type=jnp.float32) + b2_ref[...]
        o_ref[...] = jax.nn.sigmoid(logits)  # lane-dense (tB, O_pad) store
        # (padded columns hold sigmoid(0)=0.5; they are sliced off by the wrapper)


def prepare_params(params, *, image_hw, batch, batch_tile=None, hw_tile_target=512):
    """One-time parameter prep (hoisted out of the per-call forward): fold the
    backbone projection, head Linear-1 and the 1/HW mean scale into one weight,
    replicate it per row tile, build the batch selector, and pad the output dim
    to a 128-lane multiple.  Call once, reuse across forwards."""
    wbb, w1, b1, w2, b2 = params
    C, F = wbb.shape
    O = w2.shape[1]
    H, W = image_hw
    HW = H * W

    tB = batch_tile if batch_tile is not None else _choose_batch_tile(batch, C)
    assert batch % tB == 0, "batch must be divisible by the batch tile"
    tR = tB * C
    tHW = _choose_hw_tile(HW, hw_tile_target)

    # No nonlinearity between the backbone projection and head Linear-1, so fold
    # them and the GAP mean scale into a single (C, F) weight (intentional FP
    # reassociation vs. the mean-then-two-matmuls reference).
    wf = (wbb.astype(jnp.float32) @ w1.astype(jnp.float32)) * (1.0 / HW)     # (C, F)
    # Replicated per streamed row (row r uses wf[r % C]); fine for the small
    # tB*C of this module's stand-in backbone -- revisit for very large tiles.
    wrep = jnp.tile(wf, (tB, 1))                                             # (tR, F)
    # One-hot selector summing the C channel rows of each batch element; this
    # replaces an in-kernel reshape with a tiny MXU matmul.
    sel = (jnp.arange(tR)[None, :] // C == jnp.arange(tB)[:, None]).astype(jnp.float32)

    O_pad = _round_up(O, 128)  # lane-dense output store; padding sliced off outside
    w2p = jnp.zeros((F, O_pad), jnp.float32).at[:, :O].set(w2.astype(jnp.float32))
    b2p = jnp.zeros((1, O_pad), jnp.float32).at[0, :O].set(b2.astype(jnp.float32))
    b1r = jnp.asarray(b1, jnp.float32).reshape(1, F)

    return {
        "wrep": wrep, "sel": sel, "b1": b1r, "w2p": w2p, "b2p": b2p,
        "dims": dict(C=C, F=F, O=O, O_pad=O_pad, HW=HW, tB=tB, tRows=tR, tHW=tHW),
    }


def conditional_regressor_forward(x, prepped):
    """x: (B, C, H, W) float32 -> (B, 4 * nr_target_categories) float32."""
    d = prepped["dims"]
    B, C, H, W = x.shape
    assert C == d["C"] and H * W == d["HW"], "prepare_params built for different geometry"
    tB, tR, tHW = d["tB"], d["tRows"], d["tHW"]
    F, O, O_pad, HW = d["F"], d["O"], d["O_pad"], d["HW"]
    assert B % tB == 0, "batch must be divisible by the prepared batch tile"

    # Sublane-dense 2D stream, f32 straight into the kernel (no dtype-cast pass;
    # (B*C, HW) keeps the second-minor axis dense instead of padding C to 8).
    x_flat = x.reshape(B * C, HW)

    grid = (B // tB, HW // tHW)

    cost = pl.CostEstimate(
        flops=2 * B * C * HW + 2 * B * C * F + 2 * B * F * O_pad,
        transcendentals=B * O_pad,
        bytes_accessed=4 * (B * C * HW + prepped["wrep"].size + prepped["sel"].size
                            + F + prepped["w2p"].size + prepped["b2p"].size
                            + B * O_pad),
    )

    out = pl.pallas_call(
        conditional_regressor_kernel,
        out_shape=jax.ShapeDtypeStruct((B, O_pad), jnp.float32),
        grid_spec=pltpu.PrefetchScalarGridSpec(
            num_scalar_prefetch=0,
            grid=grid,
            in_specs=[
                pl.BlockSpec((tR, tHW), lambda i, j: (i, j)),     # streamed image rows
                pl.BlockSpec((tR, F), lambda i, j: (0, 0)),       # resident weights
                pl.BlockSpec((tB, tR), lambda i, j: (0, 0)),
                pl.BlockSpec((1, F), lambda i, j: (0, 0)),
                pl.BlockSpec((F, O_pad), lambda i, j: (0, 0)),
                pl.BlockSpec((1, O_pad), lambda i, j: (0, 0)),
            ],
            out_specs=pl.BlockSpec((tB, O_pad), lambda i, j: (i, 0)),
            scratch_shapes=[pltpu.VMEM((tR, tHW), jnp.float32)],
        ),
        compiler_params=pltpu.CompilerParams(
            dimension_semantics=("parallel", "arbitrary"),
            # 2 x (tR*tHW*4B) x-buffers + acc + tiny weights stays well under
            # 32 MiB with the default tile caps; re-budget if tiles are enlarged
            # (v7x has 64 MiB physical VMEM vs 128 MiB on v5e/v6e).
            vmem_limit_bytes=32 * 1024 * 1024,
        ),
        cost_estimate=cost,
    )(x_flat, prepped["wrep"], prepped["sel"], prepped["b1"],
      prepped["w2p"], prepped["b2p"])

    return out[:, :O]


def init_params(key, in_channels, backbone_out_features, nr_target_categories):
    """Deterministic synthetic parameters matching the module's shapes."""
    k1, k2, k3, k4, k5 = jax.random.split(key, 5)
    F = backbone_out_features
    O = 4 * nr_target_categories
    wbb = jax.random.normal(k1, (in_channels, F), jnp.float32) * 0.1  # synthetic backbone proj
    w1 = jax.random.normal(k2, (F, F), jnp.float32) * 0.1             # head Linear 1
    b1 = jax.random.normal(k3, (F,), jnp.float32) * 0.01
    w2 = jax.random.normal(k4, (F, O), jnp.float32) * 0.1             # head Linear 2
    b2 = jax.random.normal(k5, (O,), jnp.float32) * 0.01
    return (wbb, w1, b1, w2, b2)


def _reference_forward(x, params):
    """Pure-JAX reference of the same (eval-mode) forward pass, all f32."""
    wbb, w1, b1, w2, b2 = params
    B, C, H, W = x.shape
    feat = jnp.mean(x.reshape(B, C, H * W), axis=-1)          # GAP
    emb = feat @ wbb                                          # synthetic backbone proj
    h = jnp.maximum(emb @ w1 + b1, 0.0)                       # Linear -> ReLU
    return jax.nn.sigmoid(h @ w2 + b2)                        # Linear -> Sigmoid


if __name__ == "__main__":
    # TODO(synk): real torchvision backbone ('imagenet-rn') is an external pretrained
    # trunk; replaced by a deterministic GAP + linear projection stand-in with the
    # same output feature size (folded into the head's first matmul).
    B, C, H, W = 2, 4, 16, 16
    backbone_out_features = 32
    nr_target_categories = 3

    key = jax.random.PRNGKey(0)
    kx, kx2, kp = jax.random.split(key, 3)
    x = jax.random.normal(kx, (B, C, H, W), jnp.float32)
    params = init_params(kp, C, backbone_out_features, nr_target_categories)

    # One-time parameter prep (weight folding / padding hoisted out of forward).
    prepped = prepare_params(params, image_hw=(H, W), batch=B)
    out = jax.block_until_ready(conditional_regressor_forward(x, prepped))
    ref = _reference_forward(x, params)

    assert out.shape == (B, 4 * nr_target_categories)
    assert out.dtype == jnp.float32
    assert bool(jnp.all((out >= 0.0) & (out <= 1.0)))                     # sigmoid range
    assert bool(jnp.allclose(out, ref, atol=1e-4, rtol=1e-4)), \
        float(jnp.max(jnp.abs(out - ref)))

    # Secondary check at a larger spatial size so the multi-step accumulator
    # path (grid[1] > 1 with the 512-lane HW tile) is actually exercised.
    H2 = W2 = 32
    x2 = jax.random.normal(kx2, (B, C, H2, W2), jnp.float32)
    prepped2 = prepare_params(params, image_hw=(H2, W2), batch=B)
    out2 = jax.block_until_ready(conditional_regressor_forward(x2, prepped2))
    ref2 = _reference_forward(x2, params)
    assert bool(jnp.allclose(out2, ref2, atol=1e-4, rtol=1e-4)), \
        float(jnp.max(jnp.abs(out2 - ref2)))

    print("KERNEL_OK")
</pallas_src>

<mosaic_0001>
module attributes {stable_mosaic.version = 11 : i64} {
  func.func @conditional_regressor_kernel(%arg0: i32, %arg1: i32, %arg2: memref<8x256xf32, #tpu.memory_space<vmem>>, %arg3: memref<8x32xf32, #tpu.memory_space<vmem>>, %arg4: memref<2x8xf32, #tpu.memory_space<vmem>>, %arg5: memref<1x32xf32, #tpu.memory_space<vmem>>, %arg6: memref<32x128xf32, #tpu.memory_space<vmem>>, %arg7: memref<1x128xf32, #tpu.memory_space<vmem>>, %arg8: memref<2x128xf32, #tpu.memory_space<vmem>>, %arg9: memref<8x256xf32, #tpu.memory_space<vmem>>) attributes {dimension_semantics = [#tpu.dimension_semantics<parallel>, #tpu.dimension_semantics<arbitrary>], iteration_bounds = array<i64: 1, 1>, scalar_prefetch = 0 : i64, scratch_operands = 1 : i64, tpu.core_type = #tpu.core_type<tc>, window_params = [{transform_indices = @transform_0, window_bounds = array<i64: 8, 256>}, {pipeline_mode = #tpu.pipeline_mode<synchronous>, transform_indices = @transform_1, window_bounds = array<i64: 8, 32>}, {pipeline_mode = #tpu.pipeline_mode<synchronous>, transform_indices = @transform_2, window_bounds = array<i64: 2, 8>}, {pipeline_mode = #tpu.pipeline_mode<synchronous>, transform_indices = @transform_3, window_bounds = array<i64: 1, 32>}, {pipeline_mode = #tpu.pipeline_mode<synchronous>, transform_indices = @transform_4, window_bounds = array<i64: 32, 128>}, {pipeline_mode = #tpu.pipeline_mode<synchronous>, transform_indices = @transform_5, window_bounds = array<i64: 1, 128>}, {transform_indices = @transform_6, window_bounds = array<i64: 2, 128>}]} {
    %c0_i32 = arith.constant 0 : i32
    %0 = arith.cmpi eq, %arg1, %c0_i32 : i32
    %1 = arith.extui %0 : i1 to i32
    %c0_i32_0 = arith.constant 0 : i32
    %2 = arith.cmpi ne, %1, %c0_i32_0 : i32
    scf.if %2 {
      %cst = arith.constant 0.000000e+00 : f32
      %10 = vector.broadcast %cst : f32 to vector<8x256xf32>
      %c0_8 = arith.constant 0 : index
      %c0_9 = arith.constant 0 : index
      %11 = vector.load %arg9[%c0_8, %c0_9] : memref<8x256xf32, #tpu.memory_space<vmem>>, vector<8x256xf32>
      tpu.vector_store %arg9[%c0_8, %c0_9], %10 {strides = array<i32>} : memref<8x256xf32, #tpu.memory_space<vmem>>, vector<8x256xf32>,
    } else {
    }
    %c0 = arith.constant 0 : index
    %c0_1 = arith.constant 0 : index
    %3 = vector.load %arg9[%c0, %c0_1] : memref<8x256xf32, #tpu.memory_space<vmem>>, vector<8x256xf32>
    %c0_2 = arith.constant 0 : index
    %c0_3 = arith.constant 0 : index
    %4 = vector.load %arg2[%c0_2, %c0_3] : memref<8x256xf32, #tpu.memory_space<vmem>>, vector<8x256xf32>
    %5 = arith.addf %3, %4 : vector<8x256xf32>
    %c0_4 = arith.constant 0 : index
    %c0_5 = arith.constant 0 : index
    %6 = vector.load %arg9[%c0_4, %c0_5] : memref<8x256xf32, #tpu.memory_space<vmem>>, vector<8x256xf32>
    tpu.vector_store %arg9[%c0_4, %c0_5], %5 {strides = array<i32>} : memref<8x256xf32, #tpu.memory_space<vmem>>, vector<8x256xf32>,
    %c0_i32_6 = arith.constant 0 : i32
    %7 = arith.cmpi eq, %arg1, %c0_i32_6 : i32
    %8 = arith.extui %7 : i1 to i32
    %c0_i32_7 = arith.constant 0 : i32
    %9 = arith.cmpi ne, %8, %c0_i32_7 : i32
    scf.if %9 {
      %c0_8 = arith.constant 0 : index
      %c0_9 = arith.constant 0 : index
      %10 = vector.load %arg9[%c0_8, %c0_9] : memref<8x256xf32, #tpu.memory_space<vmem>>, vector<8x256xf32>
      %cst = arith.constant dense<0.000000e+00> : vector<8xf32>
      %11 = vector.multi_reduction <add>, %10, %cst [1] : vector<8x256xf32> to vector<8xf32>
      %12 = vector.shape_cast %11 : vector<8xf32> to vector<8x1xf32>
      %c0_10 = arith.constant 0 : index
      %c0_11 = arith.constant 0 : index
      %13 = vector.load %arg3[%c0_10, %c0_11] : memref<8x32xf32, #tpu.memory_space<vmem>>, vector<8x32xf32>
      %14 = vector.broadcast %12 : vector<8x1xf32> to vector<8x32xf32>
      %15 = arith.mulf %14, %13 : vector<8x32xf32>
      %c0_12 = arith.constant 0 : index
      %c0_13 = arith.constant 0 : index
      %16 = vector.load %arg4[%c0_12, %c0_13] : memref<2x8xf32, #tpu.memory_space<vmem>>, vector<2x8xf32>
      %cst_14 = arith.constant dense<0.000000e+00> : vector<2x32xf32>
      %17 = tpu.matmul %16, %15, %cst_14 {dimension_numbers = #tpu.dot_dimension_numbers<[1], [0], [0], [1], [0, 0, 1, 1], [], []>} : vector<2x8xf32>, vector<8x32xf32>, vector<2x32xf32> -> vector<2x32xf32>
      %c0_15 = arith.constant 0 : index
      %c0_16 = arith.constant 0 : index
      %18 = vector.load %arg5[%c0_15, %c0_16] : memref<1x32xf32, #tpu.memory_space<vmem>>, vector<1x32xf32>
      %19 = vector.broadcast %18 : vector<1x32xf32> to vector<2x32xf32>
      %20 = arith.addf %17, %19 : vector<2x32xf32>
      %cst_17 = arith.constant 0.000000e+00 : f32
      %21 = vector.broadcast %cst_17 : f32 to vector<2x32xf32>
      %22 = arith.maximumf %20, %21 : vector<2x32xf32>
      %c0_18 = arith.constant 0 : index
      %c0_19 = arith.constant 0 : index
      %23 = vector.load %arg6[%c0_18, %c0_19] : memref<32x128xf32, #tpu.memory_space<vmem>>, vector<32x128xf32>
      %cst_20 = arith.constant dense<0.000000e+00> : vector<2x128xf32>
      %24 = tpu.matmul %22, %23, %cst_20 {dimension_numbers = #tpu.dot_dimension_numbers<[1], [0], [0], [1], [0, 0, 1, 1], [], []>} : vector<2x32xf32>, vector<32x128xf32>, vector<2x128xf32> -> vector<2x128xf32>
      %c0_21 = arith.constant 0 : index
      %c0_22 = arith.constant 0 : index
      %25 = vector.load %arg7[%c0_21, %c0_22] : memref<1x128xf32, #tpu.memory_space<vmem>>, vector<1x128xf32>
      %26 = vector.broadcast %25 : vector<1x128xf32> to vector<2x128xf32>
      %27 = arith.addf %24, %26 : vector<2x128xf32>
      %28 = arith.negf %27 : vector<2x128xf32>
      %29 = math.exp %28 : vector<2x128xf32>
      %cst_23 = arith.constant 1.000000e+00 : f32
      %30 = vector.broadcast %cst_23 : f32 to vector<2x128xf32>
      %31 = arith.addf %30, %29 : vector<2x128xf32>
      %32 = arith.divf %30, %31 : vector<2x128xf32>
      %c0_24 = arith.constant 0 : index
      %c0_25 = arith.constant 0 : index
      %33 = vector.load %arg8[%c0_24, %c0_25] : memref<2x128xf32, #tpu.memory_space<vmem>>, vector<2x128xf32>
      tpu.vector_store %arg8[%c0_24, %c0_25], %32 {strides = array<i32>} : memref<2x128xf32, #tpu.memory_space<vmem>>, vector<2x128xf32>,
    } else {
    }
    return
  }
  func.func @transform_0(%arg0: i32, %arg1: i32) -> (i32, i32) {
    %c0_i32 = arith.constant 0 : i32
    return %arg0, %arg1 : i32, i32
  }
  func.func @transform_1(%arg0: i32, %arg1: i32) -> (i32, i32) {
    %c0_i32 = arith.constant 0 : i32
    %c0_i32_0 = arith.constant 0 : i32
    %c0_i32_1 = arith.constant 0 : i32
    return %c0_i32, %c0_i32_0 : i32, i32
  }
  func.func @transform_2(%arg0: i32, %arg1: i32) -> (i32, i32) {
    %c0_i32 = arith.constant 0 : i32
    %c0_i32_0 = arith.constant 0 : i32
    %c0_i32_1 = arith.constant 0 : i32
    return %c0_i32, %c0_i32_0 : i32, i32
  }
  func.func @transform_3(%arg0: i32, %arg1: i32) -> (i32, i32) {
    %c0_i32 = arith.constant 0 : i32
    %c0_i32_0 = arith.constant 0 : i32
    %c0_i32_1 = arith.constant 0 : i32
    return %c0_i32, %c0_i32_0 : i32, i32
  }
  func.func @transform_4(%arg0: i32, %arg1: i32) -> (i32, i32) {
    %c0_i32 = arith.constant 0 : i32
    %c0_i32_0 = arith.constant 0 : i32
    %c0_i32_1 = arith.constant 0 : i32
    return %c0_i32, %c0_i32_0 : i32, i32
  }
  func.func @transform_5(%arg0: i32, %arg1: i32) -> (i32, i32) {
    %c0_i32 = arith.constant 0 : i32
    %c0_i32_0 = arith.constant 0 : i32
    %c0_i32_1 = arith.constant 0 : i32
    return %c0_i32, %c0_i32_0 : i32, i32
  }
  func.func @transform_6(%arg0: i32, %arg1: i32) -> (i32, i32) {
    %c0_i32 = arith.constant 0 : i32
    %c0_i32_0 = arith.constant 0 : i32
    return %arg0, %c0_i32 : i32, i32
  }
}

</mosaic_0001>

<bundles_post_ra>
// kernel: tpu_custom_call.1
= control target key start
LH: loop header
LB: loop body
LE: loop exit
PB: predicated region body
PF: predicated region fallthrough
CT: control target
= control target key end

     0   :  { %11 = vsyncpa [#allocation4], 0  ;;  %s413_s0 = inlined_call_operand.hbm [shape: f32[8,256], index: 0, kind: input, shape index: {}]   ;;  %s414_s1 = inlined_call_operand.hbm [shape: f32[8,32], index: 1, kind: input, shape index: {}]   ;;  %s415_s2 = inlined_call_operand.hbm [shape: f32[2,8], index: 2, kind: input, shape index: {}]   ;;  %s416_s3 = inlined_call_operand.vmem [shape: f32[1,32], index: 3, kind: input, shape index: {}]   ;;  %s417_s4 = inlined_call_operand.hbm [shape: f32[32,128], index: 4, kind: input, shape index: {}]   ;;  %s418_s5 = inlined_call_operand.vmem [shape: f32[1,128], index: 5, kind: input, shape index: {}]   ;;  %s419_s6 = inlined_call_operand.hbm [shape: f32[2,128], index: 6, kind: output, shape index: {}]  }
   0x1   :  { %12 = vsyncpa [#allocation7], 0 }
   0x2   :  { %13 = vsyncpa [#allocation10], 0  ;;  %s31_s23 = sshll.u32 %s414_s1, 4  ;;  %s32_s23 = int_to_ptr.hbm [resolvable:$true] %s31_s23 }
   0x3   :  { %14 = vsyncpa [#allocation5], 0  ;;  %s350_s24 = smov [#allocation6]   ;;  %s20_s28 = sshll.u32 %s413_s0, 4  ;;  %s21_s28 = int_to_ptr.hbm [resolvable:$true] %s20_s28 }
   0x4   :  { %s33_s25 = sshll.u32 %s350_s24, 4  ;;  %s351_s29 = smov [#allocation3]   ;;  %s34_s25 = int_to_ptr.vmem [resolvable:$true] %s33_s25 }
   0x5   :  { %36 = dma.hbm_to_vmem [thread:$0]  %s32_s23, 128, %s34_s25, [#allocation7]  }
   0x6   :  { %s22_s30 = sshll.u32 %s351_s29, 4  ;;  %s42_s9 = sshll.u32 %s415_s2, 4  ;;  %s23_s30 = int_to_ptr.vmem [resolvable:$true] %s22_s30  ;;  %s43_s9 = int_to_ptr.hbm [resolvable:$true] %s42_s9 }
   0x7   :  { %25 = dma.hbm_to_vmem [thread:$0]  %s21_s28, 256, %s23_s30, [#allocation4]  }
   0x8   :  { %s54_s11 = sshll.u32 %s417_s4, 4  ;;  %s352_s12 = smov [#allocation8]   ;;  %s55_s11 = int_to_ptr.hbm [resolvable:$true] %s54_s11 }
   0x9   :  { %s44_s13 = sshll.u32 %s352_s12, 4  ;;  %s353_s0 = smov [#allocation9]   ;;  %s45_s13 = int_to_ptr.vmem [resolvable:$true] %s44_s13 }
   0xa   :  { %47 = dma.hbm_to_vmem [thread:$0]  %s43_s9, 32, %s45_s13, [#allocation7]  }
   0xb   :  { %s56_s14 = sshll.u32 %s353_s0, 4  ;;  %s354_s15 = smov 128   ;;  %s57_s14 = int_to_ptr.vmem [resolvable:$true] %s56_s14 }
   0xc   :  { %s355_s16 = smov 8  }
   0xd   :  { %62 = dma.hbm_to_vmem [thread:$0]  %s55_s11, 512, %s57_s14, [#allocation10], %s354_s15, %s354_s15, %s355_s16  }
   0xe   :  { %342 = dma.done.wait [#allocation4], 256  }
   0xf   :  { %343 = vsyncadd [#allocation4], 4294967040 }
  0x10   :  { %344 = dma.done.wait [#allocation7], 160  }
  0x11   :  { %345 = vsyncadd [#allocation7], 4294967136 }
  0x12   :  { %346 = dma.done.wait [#allocation10], 512  }
  0x13   :  { %347 = vsyncadd [#allocation10], 4294966784  ;;  %v89_v0 = vld [vmem:[#allocation3] sm:$0xff]  ;;  %v90_v1 = vld [vmem:[#allocation3 + $0x8] sm:$0xff]  ;;  %vm110_vm0 = vcmask 64512   ;;  %vm143_vm1 = vcmask 261120  }
  0x14   :  { %v100_v2 = vadd.f32 %v90_v1, %v89_v0  ;;  %v138_v3 = vld [vmem:[#allocation9 + $0x18] sm:$0xff]  ;;  %v137_v8 = vld [vmem:[#allocation9 + $0x10] sm:$0xff]  ;;  %v136_v9 = vld [vmem:[#allocation9 + $0x8] sm:$0xff] }
  0x15   :  { %159 = vmatpush.msra.mxu1 %v138_v3  ;;  %v103_v4 = vld [vmem:[#allocation6] sm:$0xff]  ;;  %v105_v7 = vld [vmem:[#allocation8] sm:$0x3]  ;;  %v135_v10 = vld [vmem:[#allocation9] sm:$0xff] }
  0x16   :  { %101 = vadd.xlane.f32.xlu0 %v100_v2  ;;  %v216_v11 = vld [vmem:[%s416_s3] ss:$0 sm:$0xff]  ;;  %s356_s3 = smov [#allocation11]  }
  0x17   :  { %160 = vmatpush.msra.mxu1 %v137_v8  ;;  %v217_v15 = vld [vmem:[%s418_s5] ss:$0 sm:$0xff]  ;;  %s192_s19 = sshll.u32 %s356_s3, 4  ;;  %s194_s5 = sshll.u32 %s419_s6, 4  ;;  %s193_s19 = int_to_ptr.vmem [resolvable:$true] %s192_s19  ;;  %s195_s5 = int_to_ptr.hbm [resolvable:$true] %s194_s5 }
  0x19   :  { %161 = vmatpush.msra.mxu1 %v136_v9 }
  0x1b   :  { %162 = vmatpush.msra.mxu1 %v135_v10 }
  0x89   :  { %v102_v5 = vpop.xlane.xlu0 %101 }
  0x8a   :  { %v104_v6 = vmul.f32 %v103_v4, %v102_v5 }
  0x8c   :  { %129 = vmatpush.msra.mxu0 %v104_v6 }
  0x8d   :  { %206 = vmatmul.msk.f32.vlgmr.msra.gmra.mxu0 %vm110_vm0, %v105_v7 }
 0x10a   :  { %v131_v12 = vpop.f32.mrf.mxu0 }
 0x10b   :  { %v132_v13 = vadd.f32 %v216_v11, %v131_v12 }
 0x10d   :  { %v134_v14 = vmax.f32 %v132_v13, 0.0 }
 0x10f   :  { %207 = vmatmul.msk.f32.vlgmr.msra.gmra.mxu1 %vm143_vm1, %v134_v14 }
 0x18c   :  { %v164_v16 = vpop.f32.mrf.mxu1 }
 0x18d   :  { %v165_v17 = vadd.f32 %v217_v15, %v164_v16 }
 0x18f   :  { %v208_v18 = vmul.f32 -1.442695, %v165_v17 }
 0x191   :  { %218 = vpow2.f32 %v208_v18 }
 0x197   :  { %v219_v19 = vpop.eup %218 }
 0x198   :  { %v170_v20 = vadd.f32 1.0, %v219_v19 }
 0x19a   :  { %220 = vrcp.f32 %v170_v20  ;;  %v182_v24 = vand.u32 2147483648, %v170_v20  ;;  %v180_v26 = vand.u32 2147483647, %v170_v20  ;;  %vm176_vm3 = vweird.f32 %v170_v20 }
 0x19c   :  { %v183_v28 = vor.u32 1.1754944e-38, %v182_v24  ;;  %vm181_vm5 = vcmp.eq.f32.partialorder %v180_v26, 8.507059e+37 }
 0x1a0   :  { %v221_v21 = vpop.eup %220 }
 0x1a1   :  { %v172_v22 = vmul.f32 %v221_v21, %v170_v20  ;;  %vm177_vm2 = vweird.f32 %v221_v21 }
 0x1a2   :  { %vm178_vm4 = vmor %vm176_vm3, %vm177_vm2 }
 0x1a3   :  { %v173_v23 = vsub.f32 1.0, %v172_v22 }
 0x1a5   :  { %v174_v25 = vmul.f32 %v221_v21, %v173_v23 }
 0x1a7   :  { %v175_v27 = vadd.f32 %v221_v21, %v174_v25 }
 0x1a9   :  { %v179_v29 = vsel %vm178_vm4, %v221_v21, %v175_v27 }
 0x1aa   :  { %v184_v30 = vsel %vm181_vm5, %v183_v28, %v179_v29 }
 0x1ab   :  { %186 = vst [vmem:[#allocation11] sm:$0x3] %v184_v30 }
 0x1ac   :  { %197 = dma.vmem_to_hbm [thread:$0]  %s193_s19, 32, %s195_s5, [#allocation5]  }
 0x1ad   :  { %348 = dma.done.wait [#allocation5], 32  }
 0x1ae   :  { %349 = vsyncadd [#allocation5], 4294967264 }
 0x1af   :  { %202 = vsyncpa [#allocation4], 1 }
 0x1b0   :  { %203 = vsyncpa [#allocation7], 1 }
 0x1b1   :  { %204 = vsyncpa [#allocation10], 1 }
 0x1b2   :  { %205 = vsyncpa [#allocation5], 1 }

</bundles_post_ra>
